<compile_context>
chip_gen: v5e
topology: v5e:2x2
jax: 0.10.0
libtpu: 0.0.40
codegen_flags: <defaults>
</compile_context>

<pallas_src>
import jax
import jax.numpy as jnp
from jax.experimental import pallas as pl
from jax.experimental.pallas import tpu as pltpu


# ----------------------------------------------------------------------------
# Kernel bodies
# ----------------------------------------------------------------------------
def _loss_tile(pred, true, margin):
    """Elementwise contrastive loss on one f32 tile (one fewer multiply)."""
    md = jnp.maximum(margin - pred, 0.0)
    p2 = pred * pred
    md2 = md * md
    # (1-t)*p^2 + t*md^2  ==  p^2 + t*(md^2 - p^2)
    return p2 + true * (md2 - p2)


def _contrastive_sum_kernel(margin_ref, pred_ref, true_ref, out_ref, acc_ref):
    """Grid reduction: VPU accumulate per tile, reduce once in the epilogue."""
    @pl.when(pl.program_id(0) == 0)
    def _init():
        acc_ref[...] = jnp.zeros_like(acc_ref)

    margin = margin_ref[0, 0]
    pred = pred_ref[...].astype(jnp.float32)
    true = true_ref[...].astype(jnp.float32)
    acc_ref[...] += _loss_tile(pred, true, margin)

    @pl.when(pl.program_id(0) == pl.num_programs(0) - 1)
    def _finalize():
        # Sublane reduce (rows -> 1); the final 1xLANES sum happens outside.
        out_ref[...] = jnp.sum(acc_ref[...], axis=0, keepdims=True)


def _contrastive_elem_kernel(margin_ref, pred_ref, true_ref, out_ref):
    """Elementwise contrastive loss (reduction='none')."""
    margin = margin_ref[0, 0]
    pred = pred_ref[...].astype(jnp.float32)
    true = true_ref[...].astype(jnp.float32)
    out_ref[...] = _loss_tile(pred, true, margin).astype(out_ref.dtype)


# ----------------------------------------------------------------------------
# Wrapper
# ----------------------------------------------------------------------------
def _cdiv(a, b):
    return -(-a // b)


def _pad_reshape(flat, rows_padded, lanes):
    n = flat.shape[0]
    total = rows_padded * lanes
    if total != n:
        flat = jnp.pad(flat, (0, total - n))
    return flat.reshape(rows_padded, lanes)


def contrastive_distance_loss(distance_pred, distance_true, *,
                              margin=1.0, reduction="mean",
                              lanes=512, max_block_rows=512):
    reduction = reduction or "none"
    bs = distance_true.shape[0]          # PyTorch: len(distance_true)
    orig_shape = distance_pred.shape

    out_dtype = distance_pred.dtype
    if not jnp.issubdtype(out_dtype, jnp.floating):
        out_dtype = jnp.dtype(jnp.float32)
    out_dtype = jnp.dtype(out_dtype)

    # Shrink the label HBM stream: bool labels travel as int8.
    if jnp.issubdtype(distance_true.dtype, jnp.bool_):
        distance_true = distance_true.astype(jnp.int8)

    pred_flat = distance_pred.reshape(-1)
    true_flat = distance_true.reshape(-1)
    assert pred_flat.shape == true_flat.shape, "pred/true shape mismatch"
    n = pred_flat.shape[0]

    # Lane/sublane-dense layout: (rows_padded, lanes), rows multiple of 8.
    rows = max(_cdiv(n, lanes), 1)
    if rows <= max_block_rows:
        block_rows = _cdiv(rows, 8) * 8
        rows_padded = block_rows
    else:
        block_rows = max_block_rows
        rows_padded = _cdiv(rows, block_rows) * block_rows
    num_blocks = rows_padded // block_rows
    n_total = rows_padded * lanes

    pred2d = _pad_reshape(pred_flat, rows_padded, lanes)
    true2d = _pad_reshape(true_flat, rows_padded, lanes)
    margin_arr = jnp.full((1, 1), margin, dtype=jnp.float32)

    bytes_in = n_total * (pred2d.dtype.itemsize + true2d.dtype.itemsize)

    tile_spec = pl.BlockSpec((block_rows, lanes), lambda i: (i, 0))
    smem_spec = pl.BlockSpec(memory_space=pltpu.MemorySpace.SMEM)

    if reduction == "none":
        out2d = pl.pallas_call(
            _contrastive_elem_kernel,
            out_shape=jax.ShapeDtypeStruct((rows_padded, lanes), out_dtype),
            grid=(num_blocks,),
            in_specs=[smem_spec, tile_spec, tile_spec],
            out_specs=pl.BlockSpec((block_rows, lanes), lambda i: (i, 0)),
            compiler_params=pltpu.CompilerParams(
                dimension_semantics=("parallel",)),
            cost_estimate=pl.CostEstimate(
                flops=6 * n_total, transcendentals=0,
                bytes_accessed=bytes_in + n_total * out_dtype.itemsize),
        )(margin_arr, pred2d, true2d)
        return out2d.reshape(-1)[:n].reshape(orig_shape)

    # 'mean' or 'sum': grid reduction into a VMEM accumulator.
    partial = pl.pallas_call(
        _contrastive_sum_kernel,
        out_shape=jax.ShapeDtypeStruct((1, lanes), jnp.float32),
        grid=(num_blocks,),
        in_specs=[smem_spec, tile_spec, tile_spec],
        out_specs=pl.BlockSpec((1, lanes), lambda i: (0, 0)),
        scratch_shapes=[pltpu.VMEM((block_rows, lanes), jnp.float32)],
        compiler_params=pltpu.CompilerParams(
            dimension_semantics=("arbitrary",)),
        cost_estimate=pl.CostEstimate(
            flops=7 * n_total, transcendentals=0,
            bytes_accessed=bytes_in + lanes * 4),
    )(margin_arr, pred2d, true2d)

    total = jnp.sum(partial)             # trivial 1xLANES epilogue in plain JAX
    if reduction == "mean":
        return total / 2.0 / bs
    return total                          # 'sum'


# ----------------------------------------------------------------------------
# Pure-JAX reference (for correctness checks)
# ----------------------------------------------------------------------------
def _reference(distance_pred, distance_true, margin=1.0, reduction="mean"):
    bs = distance_true.shape[0]
    pred = distance_pred.astype(jnp.float32)
    true = distance_true.astype(jnp.float32)
    md = jnp.maximum(margin - pred, 0.0)
    loss = (1.0 - true) * pred ** 2 + true * md ** 2
    if reduction == "mean":
        return jnp.sum(loss) / 2.0 / bs
    if reduction == "sum":
        return jnp.sum(loss)
    return loss


if __name__ == "__main__":
    key = jax.random.PRNGKey(0)
    kp, kt = jax.random.split(key)

    # Typical usage: a (B,) vector of pairwise distances + 0/1 similarity labels.
    B = 300
    distance_pred = jax.random.uniform(kp, (B,), jnp.float32, 0.0, 2.0)
    distance_true = jax.random.bernoulli(kt, 0.5, (B,))   # bool labels

    for red in ("mean", "sum", "none"):
        out = jax.block_until_ready(
            contrastive_distance_loss(distance_pred, distance_true,
                                      margin=1.0, reduction=red))
        ref = _reference(distance_pred, distance_true, margin=1.0, reduction=red)
        assert jnp.allclose(out, ref, rtol=1e-5, atol=1e-5), (red, out, ref)

    # Exercise the multi-block grid reduction (small per-block tiles so the
    # test shapes stay tiny while still running a >1-step grid).
    kp2, kt2 = jax.random.split(jax.random.PRNGKey(1))
    B2 = 5000
    pred2 = jax.random.uniform(kp2, (B2,), jnp.float32, 0.0, 2.0)
    true2 = jax.random.uniform(kt2, (B2,), jnp.float32, 0.0, 1.0)  # float "true distances"

    out_m = jax.block_until_ready(
        contrastive_distance_loss(pred2, true2, margin=1.25, reduction="mean",
                                  lanes=128, max_block_rows=8))
    ref_m = _reference(pred2, true2, margin=1.25, reduction="mean")
    assert jnp.allclose(out_m, ref_m, rtol=1e-4, atol=1e-5), (out_m, ref_m)

    out_n = jax.block_until_ready(
        contrastive_distance_loss(pred2, true2, margin=1.25, reduction="none",
                                  lanes=128, max_block_rows=8))
    ref_n = _reference(pred2, true2, margin=1.25, reduction="none")
    assert jnp.allclose(out_n, ref_n, rtol=1e-5, atol=1e-5), "reduction='none' mismatch"

    print("KERNEL_OK")
</pallas_src>

<mosaic_0001>
module attributes {stable_mosaic.version = 11 : i64} {
  func.func @_contrastive_sum_kernel(%arg0: i32, %arg1: memref<1x1xf32, #tpu.memory_space<smem>>, %arg2: memref<8x512xf32, #tpu.memory_space<vmem>>, %arg3: memref<8x512xi8, #tpu.memory_space<vmem>>, %arg4: memref<1x512xf32, #tpu.memory_space<vmem>>, %arg5: memref<8x512xf32, #tpu.memory_space<vmem>>) attributes {dimension_semantics = [#tpu.dimension_semantics<arbitrary>], iteration_bounds = array<i64: 1>, scalar_prefetch = 0 : i64, scratch_operands = 1 : i64, tpu.core_type = #tpu.core_type<tc>, window_params = [{transform_indices = @transform_0, window_bounds = array<i64: 1, 1>}, {transform_indices = @transform_1, window_bounds = array<i64: 8, 512>}, {transform_indices = @transform_2, window_bounds = array<i64: 8, 512>}, {pipeline_mode = #tpu.pipeline_mode<synchronous>, transform_indices = @transform_3, window_bounds = array<i64: 1, 512>}]} {
    %c0_i32 = arith.constant 0 : i32
    %0 = arith.cmpi eq, %arg0, %c0_i32 : i32
    %1 = arith.extui %0 : i1 to i32
    %c0_i32_0 = arith.constant 0 : i32
    %2 = arith.cmpi ne, %1, %c0_i32_0 : i32
    scf.if %2 {
      %cst_12 = arith.constant 0.000000e+00 : f32
      %22 = vector.broadcast %cst_12 : f32 to vector<8x512xf32>
      %c0_13 = arith.constant 0 : index
      %c0_14 = arith.constant 0 : index
      %23 = vector.load %arg5[%c0_13, %c0_14] : memref<8x512xf32, #tpu.memory_space<vmem>>, vector<8x512xf32>
      tpu.vector_store %arg5[%c0_13, %c0_14], %22 {strides = array<i32>} : memref<8x512xf32, #tpu.memory_space<vmem>>, vector<8x512xf32>,
    } else {
    }
    %c0 = arith.constant 0 : index
    %c0_1 = arith.constant 0 : index
    %3 = memref.load %arg1[%c0, %c0_1] : memref<1x1xf32, #tpu.memory_space<smem>>
    %c0_2 = arith.constant 0 : index
    %c0_3 = arith.constant 0 : index
    %4 = vector.load %arg2[%c0_2, %c0_3] : memref<8x512xf32, #tpu.memory_space<vmem>>, vector<8x512xf32>
    %c0_4 = arith.constant 0 : index
    %c0_5 = arith.constant 0 : index
    %5 = vector.load %arg3[%c0_4, %c0_5] : memref<8x512xi8, #tpu.memory_space<vmem>>, vector<8x512xi8>
    %6 = arith.sitofp %5 : vector<8x512xi8> to vector<8x512xf32>
    %c0_6 = arith.constant 0 : index
    %c0_7 = arith.constant 0 : index
    %7 = vector.load %arg5[%c0_6, %c0_7] : memref<8x512xf32, #tpu.memory_space<vmem>>, vector<8x512xf32>
    %8 = vector.broadcast %3 : f32 to vector<8x512xf32>
    %9 = arith.subf %8, %4 : vector<8x512xf32>
    %cst = arith.constant 0.000000e+00 : f32
    %10 = vector.broadcast %cst : f32 to vector<8x512xf32>
    %11 = arith.maximumf %9, %10 : vector<8x512xf32>
    %12 = arith.mulf %4, %4 : vector<8x512xf32>
    %13 = arith.mulf %11, %11 : vector<8x512xf32>
    %14 = arith.subf %13, %12 : vector<8x512xf32>
    %15 = arith.mulf %6, %14 : vector<8x512xf32>
    %16 = arith.addf %12, %15 : vector<8x512xf32>
    %17 = arith.addf %7, %16 : vector<8x512xf32>
    %c0_8 = arith.constant 0 : index
    %c0_9 = arith.constant 0 : index
    %18 = vector.load %arg5[%c0_8, %c0_9] : memref<8x512xf32, #tpu.memory_space<vmem>>, vector<8x512xf32>
    tpu.vector_store %arg5[%c0_8, %c0_9], %17 {strides = array<i32>} : memref<8x512xf32, #tpu.memory_space<vmem>>, vector<8x512xf32>,
    %c0_i32_10 = arith.constant 0 : i32
    %19 = arith.cmpi eq, %arg0, %c0_i32_10 : i32
    %20 = arith.extui %19 : i1 to i32
    %c0_i32_11 = arith.constant 0 : i32
    %21 = arith.cmpi ne, %20, %c0_i32_11 : i32
    scf.if %21 {
      %c0_12 = arith.constant 0 : index
      %c0_13 = arith.constant 0 : index
      %22 = vector.load %arg5[%c0_12, %c0_13] : memref<8x512xf32, #tpu.memory_space<vmem>>, vector<8x512xf32>
      %cst_14 = arith.constant dense<0.000000e+00> : vector<512xf32>
      %23 = vector.multi_reduction <add>, %22, %cst_14 [0] : vector<8x512xf32> to vector<512xf32>
      %24 = vector.shape_cast %23 : vector<512xf32> to vector<1x512xf32>
      %c0_15 = arith.constant 0 : index
      %c0_16 = arith.constant 0 : index
      %25 = vector.load %arg4[%c0_15, %c0_16] : memref<1x512xf32, #tpu.memory_space<vmem>>, vector<1x512xf32>
      tpu.vector_store %arg4[%c0_15, %c0_16], %24 {strides = array<i32>} : memref<1x512xf32, #tpu.memory_space<vmem>>, vector<1x512xf32>,
    } else {
    }
    return
  }
  func.func @transform_0(%arg0: i32) -> (i32, i32) {
    %c0_i32 = arith.constant 0 : i32
    %c0_i32_0 = arith.constant 0 : i32
    %c0_i32_1 = arith.constant 0 : i32
    return %c0_i32, %c0_i32_0 : i32, i32
  }
  func.func @transform_1(%arg0: i32) -> (i32, i32) {
    %c0_i32 = arith.constant 0 : i32
    %c0_i32_0 = arith.constant 0 : i32
    return %arg0, %c0_i32 : i32, i32
  }
  func.func @transform_2(%arg0: i32) -> (i32, i32) {
    %c0_i32 = arith.constant 0 : i32
    %c0_i32_0 = arith.constant 0 : i32
    return %arg0, %c0_i32 : i32, i32
  }
  func.func @transform_3(%arg0: i32) -> (i32, i32) {
    %c0_i32 = arith.constant 0 : i32
    %c0_i32_0 = arith.constant 0 : i32
    %c0_i32_1 = arith.constant 0 : i32
    return %c0_i32, %c0_i32_0 : i32, i32
  }
}

</mosaic_0001>

<bundles_post_ra>
// kernel: tpu_custom_call.1
= control target key start
LH: loop header
LB: loop body
LE: loop exit
PB: predicated region body
PF: predicated region fallthrough
CT: control target
= control target key end

     0   :  { %9 = vsyncpa [#allocation5], 0  ;;  %s291_s0 = inlined_call_operand.<no memory space> [shape: f32[1,1], index: 0, kind: input, shape index: {}]   ;;  %s292_s1 = inlined_call_operand.hbm [shape: f32[8,512], index: 1, kind: input, shape index: {}]   ;;  %s293_s2 = inlined_call_operand.hbm [shape: s8[8,512], index: 2, kind: input, shape index: {}]   ;;  %s294_s3 = inlined_call_operand.hbm [shape: f32[1,512], index: 3, kind: output, shape index: {}]  }
   0x1   :  { %10 = vsyncpa [#allocation8], 0 }
   0x2   :  { %11 = vsyncpa [#allocation6], 0  ;;  %s19_s14 = sshll.u32 %s292_s1, 4  ;;  %s256_s15 = smov [#allocation4]   ;;  %s20_s14 = int_to_ptr.hbm [resolvable:$true] %s19_s14 }
   0x3   :  { %s21_s16 = sshll.u32 %s256_s15, 4  ;;  %s30_s19 = sshll.u32 %s293_s2, 4  ;;  %s22_s16 = int_to_ptr.vmem [resolvable:$true] %s21_s16  ;;  %s31_s19 = int_to_ptr.hbm [resolvable:$true] %s30_s19 }
   0x4   :  { %24 = dma.hbm_to_vmem [thread:$0]  %s20_s14, 512, %s22_s16, [#allocation5]  }
   0x5   :  { %s257_s20 = smov [#allocation7]  }
   0x6   :  { %s32_s21 = sshll.u32 %s257_s20, 4  ;;  %s33_s21 = int_to_ptr.vmem [resolvable:$true] %s32_s21 }
   0x7   :  { %35 = dma.hbm_to_vmem [thread:$0]  %s31_s19, 128, %s33_s21, [#allocation8]  }
   0x8   :  { %250 = dma.done.wait [#allocation5], 512  }
   0x9   :  { %251 = vsyncadd [#allocation5], 4294966784 }
   0xa   :  { %252 = dma.done.wait [#allocation8], 128  }
   0xb   :  { %253 = vsyncadd [#allocation8], 4294967168  ;;  %v70_v0 = vstv %s291_s0  ;;  %v53_v1 = vld [vmem:[#allocation4] sm:$0xff]  ;;  %v54_v2 = vld [vmem:[#allocation4 + $0x8] sm:$0xff]  ;;  %vm145_vm0 = vcmask 1040384   ;;  %vm147_vm1 = vcmask 1042434  }
   0xc   :  { %v55_v3 = vld [vmem:[#allocation4 + $0x10] sm:$0xff]  ;;  %v56_v4 = vld [vmem:[#allocation4 + $0x18] sm:$0xff]  ;;  %v57_v5 = vld [vmem:[#allocation7] sm:$0xff]  ;;  %v71_v6 = vsub.f32 %v70_v0, %v53_v1  ;;  %v72_v7 = vsub.f32 %v70_v0, %v54_v2  ;;  %v79_v19 = vmul.f32 %v53_v1, %v53_v1  ;;  %v80_v21 = vmul.f32 %v54_v2, %v54_v2  ;;  %s258_s0 = smov [#allocation9]   ;;  %s164_s25 = sshll.u32 %s294_s3, 4  ;;  %s165_s25 = int_to_ptr.hbm [resolvable:$true] %s164_s25 }
   0xd   :  { %v73_v8 = vsub.f32 %v70_v0, %v55_v3  ;;  %v58_v9 = vunpack.c.0.s8 %v57_v5  ;;  %v59_v10 = vunpack.c.1.s8 %v57_v5  ;;  %v60_v11 = vunpack.c.2.s8 %v57_v5  ;;  %s162_s2 = sshll.u32 %s258_s0, 4  ;;  %s163_s2 = int_to_ptr.vmem [resolvable:$true] %s162_s2 }
   0xe   :  { %v61_v12 = vunpack.c.3.s8 %v57_v5  ;;  %v74_v13 = vsub.f32 %v70_v0, %v56_v4  ;;  %v75_v14 = vmax.f32 %v71_v6, 0.0  ;;  %v76_v15 = vmax.f32 %v72_v7, 0.0 }
   0xf   :  { %v77_v16 = vmax.f32 %v73_v8, 0.0  ;;  %v62_v17 = vcvt.s32.f32 %v58_v9  ;;  %v63_v18 = vcvt.s32.f32 %v59_v10  ;;  %v81_v22 = vmul.f32 %v55_v3, %v55_v3 }
  0x10   :  { %v78_v20 = vmax.f32 %v74_v13, 0.0  ;;  %v82_v23 = vmul.f32 %v56_v4, %v56_v4  ;;  %v64_v24 = vcvt.s32.f32 %v60_v11  ;;  %v83_v25 = vmul.f32 %v75_v14, %v75_v14 }
  0x11   :  { %v84_v26 = vmul.f32 %v76_v15, %v76_v15  ;;  %v85_v27 = vmul.f32 %v77_v16, %v77_v16  ;;  %v65_v28 = vcvt.s32.f32 %v61_v12  ;;  %v152_v1 = vlaneseq }
  0x12   :  { %v86_v29 = vmul.f32 %v78_v20, %v78_v20  ;;  %v87_v30 = vsub.f32 %v83_v25, %v79_v19  ;;  %vm149_vm2 = vcmask 1041408  }
  0x13   :  { %v88_v31 = vsub.f32 %v84_v26, %v80_v21  ;;  %v89_v32 = vsub.f32 %v85_v27, %v81_v22  ;;  %vm154_vm3 = vcmp.lt.s32.totalorder %v152_v1, 512 }
  0x14   :  { %v90_v33 = vsub.f32 %v86_v29, %v82_v23  ;;  %v91_v34 = vmul.f32 %v87_v30, %v62_v17 }
  0x15   :  { %v92_v35 = vmul.f32 %v88_v31, %v63_v18  ;;  %v93_v36 = vmul.f32 %v89_v32, %v64_v24 }
  0x16   :  { %v94_v37 = vmul.f32 %v90_v33, %v65_v28  ;;  %v95_v38 = vadd.f32 %v91_v34, %v79_v19 }
  0x17   :  { %v96_v39 = vadd.f32 %v92_v35, %v80_v21  ;;  %v97_v40 = vadd.f32 %v93_v36, %v81_v22 }
  0x18   :  { %v98_v41 = vadd.f32 %v94_v37, %v82_v23  ;;  %v114_v42 = vrot.slane %v95_v38, 4 }
  0x19   :  { %v120_v43 = vrot.slane %v96_v39, 4  ;;  %v126_v44 = vrot.slane %v97_v40, 4 }
  0x1a   :  { %v132_v45 = vrot.slane %v98_v41, 4  ;;  %v115_v46 = vadd.f32 %v114_v42, %v95_v38 }
  0x1b   :  { %v121_v47 = vadd.f32 %v120_v43, %v96_v39  ;;  %v127_v48 = vadd.f32 %v126_v44, %v97_v40 }
  0x1c   :  { %v133_v49 = vadd.f32 %v132_v45, %v98_v41  ;;  %v116_v50 = vrot.slane %v115_v46, 2 }
  0x1d   :  { %v122_v51 = vrot.slane %v121_v47, 2  ;;  %v128_v52 = vrot.slane %v127_v48, 2 }
  0x1e   :  { %v134_v53 = vrot.slane %v133_v49, 2  ;;  %v117_v54 = vadd.f32 %v116_v50, %v115_v46 }
  0x1f   :  { %v123_v55 = vadd.f32 %v122_v51, %v121_v47  ;;  %v129_v56 = vadd.f32 %v128_v52, %v127_v48 }
  0x20   :  { %v135_v57 = vadd.f32 %v134_v53, %v133_v49  ;;  %v118_v58 = vrot.slane %v117_v54, 1 }
  0x21   :  { %v124_v59 = vrot.slane %v123_v55, 1  ;;  %v130_v60 = vrot.slane %v129_v56, 1 }
  0x22   :  { %v136_v61 = vrot.slane %v135_v57, 1  ;;  %v119_v62 = vadd.f32 %v118_v58, %v117_v54 }
  0x23   :  { %v125_v63 = vadd.f32 %v124_v59, %v123_v55  ;;  %v131_v0 = vadd.f32 %v130_v60, %v129_v56 }
  0x24   :  { %v137_v2 = vadd.f32 %v136_v61, %v135_v57 }
  0x25   :  { %v142_v3 = vrot.slane %v125_v63, 7  ;;  %v143_v4 = vrot.slane %v131_v0, 6 }
  0x26   :  { %v144_v5 = vrot.slane %v137_v2, 5 }
  0x27   :  { %v146_v6 = vsel %vm145_vm0, %v119_v62, %v142_v3 }
  0x28   :  { %v148_v7 = vsel %vm147_vm1, %v143_v4, %v144_v5 }
  0x29   :  { %v150_v8 = vsel %vm149_vm2, %v146_v6, %v148_v7 }
  0x2a   :  { %156 = vst.msk [vmem:[#allocation9] sm:$0xf] %vm154_vm3, %v150_v8 }
  0x2b   :  { %167 = dma.vmem_to_hbm [thread:$0]  %s163_s2, 64, %s165_s25, [#allocation6]  }
  0x2c   :  { %254 = dma.done.wait [#allocation6], 64  }
  0x2d   :  { %255 = vsyncadd [#allocation6], 4294967232 }
  0x2e   :  { %172 = vsyncpa [#allocation5], 1 }
  0x2f   :  { %173 = vsyncpa [#allocation8], 1 }
  0x30   :  { %174 = vsyncpa [#allocation6], 1 }

</bundles_post_ra>
